<compile_context>
chip_gen: v7x
topology: tpu7x:2x2x1
jax: 0.10.0
libtpu: 0.0.40
codegen_flags: <defaults>
</compile_context>

<pallas_src>
import jax
import jax.numpy as jnp
from jax.experimental import pallas as pl
from jax.experimental.pallas import tpu as pltpu


# --------------------------------------------------------------------------
# Small helpers
# --------------------------------------------------------------------------

def _round_up(x, m):
    return ((x + m - 1) // m) * m


def _cdiv(a, b):
    return (a + b - 1) // b


def _vmem_capacity_bytes():
    """Per-TensorCore VMEM capacity; conservative 64 MiB (v7x) if unknown."""
    try:
        return int(pltpu.get_tpu_info().vmem_capacity_bytes)
    except Exception:
        return 64 << 20


def _pick_divisor_tile(total, target, quantum=128):
    """Largest multiple of `quantum` that divides `total` and is <= target."""
    t = max((min(target, total) // quantum) * quantum, quantum)
    while total % t:
        t -= quantum
    return t


# --------------------------------------------------------------------------
# Kernels
# --------------------------------------------------------------------------

def _mlp_fused_kernel(x_ref, w1_ref, b1_ref, w2_ref, b2_ref, o_ref):
    """y = relu(relu(x @ W1 + b1) @ W2 + b2); W1/b1/W2/b2 resident in VMEM."""
    x = x_ref[...].astype(w1_ref.dtype)               # cast at the MXU boundary
    h1 = jnp.dot(x, w1_ref[...], preferred_element_type=jnp.float32)
    h1 = jnp.maximum(h1 + b1_ref[...], 0.0)           # f32 epilogue
    y = jnp.dot(h1.astype(w2_ref.dtype), w2_ref[...],
                preferred_element_type=jnp.float32)
    o_ref[...] = jnp.maximum(y + b2_ref[...], 0.0).astype(o_ref.dtype)


def _mlp_hidden_split_kernel(x_ref, w1_ref, b1_ref, w2_ref, b2_ref, o_ref,
                             acc_ref):
    """Same forward pass with the hidden dim tiled on grid axis 1 ("arbitrary").

    Each step computes one hidden slab h1 = relu(x @ W1[:, h] + b1[h]) and
    accumulates h1 @ W2[h, :] into an f32 VMEM scratch; bias2 + final ReLU run
    on the last hidden step.  Used when the weights don't fit resident in VMEM.
    """
    h = pl.program_id(1)

    @pl.when(h == 0)
    def _():
        acc_ref[...] = jnp.zeros_like(acc_ref)

    x = x_ref[...].astype(w1_ref.dtype)
    h1 = jnp.dot(x, w1_ref[...], preferred_element_type=jnp.float32)
    h1 = jnp.maximum(h1 + b1_ref[...], 0.0)
    acc_ref[...] += jnp.dot(h1.astype(w2_ref.dtype), w2_ref[...],
                            preferred_element_type=jnp.float32)

    @pl.when(h == pl.num_programs(1) - 1)
    def _():
        o_ref[...] = jnp.maximum(acc_ref[...] + b2_ref[...], 0.0
                                 ).astype(o_ref.dtype)


# --------------------------------------------------------------------------
# One-time parameter preparation (hoisted out of the per-call path)
# --------------------------------------------------------------------------

def prepare_params(w1, b1, w2, b2, *, lane_quantum=128):
    """Pad hid/out feature dims to lane-dense multiples of `lane_quantum` and
    cast weights to bf16 / biases to f32 ONCE at init (weights are constants).

    Zero padding is exact for this network: padded hidden units get weight and
    bias 0 so relu(0) = 0, and padded output columns are sliced off again by
    network_forward.
    """
    in_dim, hid1 = w1.shape
    hid1_w2, out_dim = w2.shape
    assert hid1_w2 == hid1
    hid_p = _round_up(hid1, lane_quantum)
    out_p = _round_up(out_dim, lane_quantum)
    bf16, f32 = jnp.bfloat16, jnp.float32
    w1p = jnp.zeros((in_dim, hid_p), bf16).at[:, :hid1].set(w1.astype(bf16))
    b1p = jnp.zeros((1, hid_p), f32).at[:, :hid1].set(
        b1.reshape(1, -1).astype(f32))
    w2p = jnp.zeros((hid_p, out_p), bf16).at[:hid1, :out_dim].set(
        w2.astype(bf16))
    b2p = jnp.zeros((1, out_p), f32).at[:, :out_dim].set(
        b2.reshape(1, -1).astype(f32))
    return dict(w1=w1p, b1=b1p, w2=w2p, b2=b2p,
                in_dim=in_dim, hid1=hid1, out_dim=out_dim)


# --------------------------------------------------------------------------
# Forward pass
# --------------------------------------------------------------------------

def network_forward(x, params, *, batch_tile=None, out_dtype=jnp.bfloat16,
                    hidden_split=None, hid_tile=512):
    """relu(linear2(relu(linear1(x)))).  `params` must come from prepare_params.

    Returns (B, out_dim) in `out_dtype` (bf16 by default to halve writeback;
    pass jnp.float32 if the caller needs f32 like the PyTorch module).
    """
    w1p, b1p, w2p, b2p = params["w1"], params["b1"], params["w2"], params["b2"]
    in_dim, out_dim = params["in_dim"], params["out_dim"]
    hid_p, out_p = w1p.shape[1], w2p.shape[1]

    B = x.shape[0]
    assert x.shape[1] == in_dim, (x.shape, in_dim)

    x_item = jnp.dtype(x.dtype).itemsize
    out_item = jnp.dtype(out_dtype).itemsize

    cap = _vmem_capacity_bytes()
    budget = cap - max(8 << 20, cap // 8)        # headroom for Mosaic scratch

    if batch_tile is None:
        # Bigger tiles on 128 MiB chips (v5e/v6e); tighter on v7x (64 MiB).
        batch_tile = 1024 if cap >= (96 << 20) else 512

    w_bytes = (w1p.size + w2p.size) * 2 + (b1p.size + b2p.size) * 4
    if hidden_split is None:
        # Assume worst case (double-buffered residents) when picking the path.
        hidden_split = 2 * w_bytes > budget // 2

    # ---- batch tiling ------------------------------------------------------
    nt = max(_cdiv(B, batch_tile), 1)
    if nt == 1 and B >= 32:
        nt = 2                                   # give v7x's 2nd TensorCore work
    tb = _round_up(_cdiv(B, nt), 16)             # 16 rows: packed bf16 sublanes

    def _stream_bytes(t):                        # double-buffered x/out tiles
        return 2 * t * in_dim * x_item + 2 * t * out_p * out_item

    resident_w = w_bytes if hidden_split else 2 * w_bytes
    while tb > 16 and _stream_bytes(tb) + resident_w > budget:
        tb = _round_up(tb // 2, 16)
    nt = _cdiv(B, tb)
    b_p = nt * tb

    # Only per-call wrapper op: zero-pad the batch dim when B % tb != 0.
    # x keeps its original dtype; the bf16 cast happens inside the kernel.
    xp = x if b_p == B else jnp.pad(x, ((0, b_p - B), (0, 0)))

    if not hidden_split:
        # ---- fast path: weights resident in VMEM across all batch tiles ----
        def run_fused(single_buffered):
            def resident(shape):
                if single_buffered:
                    return pl.BlockSpec(shape, lambda i: (0, 0),
                                        pipeline_mode=pl.Buffered(1))
                return pl.BlockSpec(shape, lambda i: (0, 0))

            w_bufs = 1 if single_buffered else 2
            need = _stream_bytes(tb) + w_bufs * w_bytes
            vmem_limit = int(min(max(need + need // 2 + (4 << 20), 32 << 20),
                                 budget))
            return pl.pallas_call(
                _mlp_fused_kernel,
                out_shape=jax.ShapeDtypeStruct((b_p, out_p), out_dtype),
                grid=(nt,),
                in_specs=[
                    pl.BlockSpec((tb, in_dim), lambda i: (i, 0)),  # streamed x
                    resident((in_dim, hid_p)),                     # resident W1
                    resident((1, hid_p)),                          # resident b1
                    resident((hid_p, out_p)),                      # resident W2
                    resident((1, out_p)),                          # resident b2
                ],
                out_specs=pl.BlockSpec((tb, out_p), lambda i: (i, 0)),
                compiler_params=pltpu.CompilerParams(
                    dimension_semantics=("parallel",),
                    vmem_limit_bytes=vmem_limit,
                ),
            )(xp, w1p, b1p, w2p, b2p)

        try:
            yp = run_fused(True)      # single-buffered resident weights
        except Exception:
            yp = run_fused(False)     # fallback: default double buffering
    else:
        # ---- fallback: stream weight slabs along the hidden dimension ------
        th = _pick_divisor_tile(hid_p, min(hid_tile, hid_p))
        nh = hid_p // th
        need = (_stream_bytes(tb) + tb * out_p * 4
                + 2 * (in_dim * th + th * out_p) * 2
                + 2 * (th + out_p) * 4)
        vmem_limit = int(min(max(need + need // 2 + (4 << 20), 32 << 20),
                             budget))
        yp = pl.pallas_call(
            _mlp_hidden_split_kernel,
            out_shape=jax.ShapeDtypeStruct((b_p, out_p), out_dtype),
            grid=(nt, nh),
            in_specs=[
                pl.BlockSpec((tb, in_dim), lambda i, h: (i, 0)),  # x tile
                pl.BlockSpec((in_dim, th), lambda i, h: (0, h)),  # W1 slab
                pl.BlockSpec((1, th), lambda i, h: (0, h)),       # b1 slab
                pl.BlockSpec((th, out_p), lambda i, h: (h, 0)),   # W2 slab
                pl.BlockSpec((1, out_p), lambda i, h: (0, 0)),    # b2
            ],
            out_specs=pl.BlockSpec((tb, out_p), lambda i, h: (i, 0)),
            scratch_shapes=[pltpu.VMEM((tb, out_p), jnp.float32)],
            compiler_params=pltpu.CompilerParams(
                dimension_semantics=("parallel", "arbitrary"),
                vmem_limit_bytes=vmem_limit,
            ),
        )(xp, w1p, b1p, w2p, b2p)

    return yp[:B, :out_dim]


# --------------------------------------------------------------------------
# Init / reference / test
# --------------------------------------------------------------------------

def init_params(key, in_dim, hid1, out_dim):
    """Deterministic init mimicking PyTorch nn.Linear default
    (uniform(-1/sqrt(fan_in), 1/sqrt(fan_in))), weights stored (in, out)."""
    k1, k2, k3, k4 = jax.random.split(key, 4)
    bound1 = 1.0 / jnp.sqrt(in_dim)
    bound2 = 1.0 / jnp.sqrt(hid1)
    w1 = jax.random.uniform(k1, (in_dim, hid1), jnp.float32, -bound1, bound1)
    b1 = jax.random.uniform(k2, (1, hid1), jnp.float32, -bound1, bound1)
    w2 = jax.random.uniform(k3, (hid1, out_dim), jnp.float32, -bound2, bound2)
    b2 = jax.random.uniform(k4, (1, out_dim), jnp.float32, -bound2, bound2)
    return w1, b1, w2, b2


def reference_forward(x, w1, b1, w2, b2):
    """Pure-JAX reference with the same bf16-operand / f32-accumulate numerics."""
    bf16, f32 = jnp.bfloat16, jnp.float32
    xb = x.astype(bf16).astype(f32)
    w1b = w1.astype(bf16).astype(f32)
    w2b = w2.astype(bf16).astype(f32)
    h = jnp.maximum(xb @ w1b + b1.reshape(1, -1), 0.0)
    y = jnp.maximum(h.astype(bf16).astype(f32) @ w2b + b2.reshape(1, -1), 0.0)
    return y


if __name__ == "__main__":
    key = jax.random.PRNGKey(0)
    kx1, kp1, kx2, kp2 = jax.random.split(key, 4)

    # --- test 1: fused fast path (resident weights), toy Network sizes ------
    B, in_dim, hid1, out_dim = 8, 32, 64, 16
    x = jax.random.normal(kx1, (B, in_dim), dtype=jnp.float32)
    w1, b1, w2, b2 = init_params(kp1, in_dim, hid1, out_dim)
    params = prepare_params(w1, b1, w2, b2)          # one-time pad/cast

    y = jax.block_until_ready(network_forward(x, params))
    y_ref = reference_forward(x, w1, b1, w2, b2)
    assert y.shape == (B, out_dim)
    err = float(jnp.max(jnp.abs(y.astype(jnp.float32) - y_ref)))
    assert jnp.allclose(y.astype(jnp.float32), y_ref, atol=2e-2, rtol=2e-2), err

    # --- test 2: hidden-split fallback path (forced), uneven B / hid1 -------
    B2, in2, hid2, out2 = 40, 48, 200, 24
    x2 = jax.random.normal(kx2, (B2, in2), dtype=jnp.float32)
    w1_2, b1_2, w2_2, b2_2 = init_params(kp2, in2, hid2, out2)
    params2 = prepare_params(w1_2, b1_2, w2_2, b2_2)
    y2 = jax.block_until_ready(
        network_forward(x2, params2, hidden_split=True, hid_tile=128))
    y2_ref = reference_forward(x2, w1_2, b1_2, w2_2, b2_2)
    assert y2.shape == (B2, out2)
    err2 = float(jnp.max(jnp.abs(y2.astype(jnp.float32) - y2_ref)))
    assert jnp.allclose(y2.astype(jnp.float32), y2_ref, atol=2e-2, rtol=2e-2), err2

    print("KERNEL_OK")
</pallas_src>

<mosaic_0001>
module attributes {stable_mosaic.version = 11 : i64} {
  func.func @_mlp_fused_kernel(%arg0: i32, %arg1: memref<16x32xf32, #tpu.memory_space<vmem>>, %arg2: memref<32x128xbf16, #tpu.memory_space<vmem>>, %arg3: memref<1x128xf32, #tpu.memory_space<vmem>>, %arg4: memref<128x128xbf16, #tpu.memory_space<vmem>>, %arg5: memref<1x128xf32, #tpu.memory_space<vmem>>, %arg6: memref<16x128xbf16, #tpu.memory_space<vmem>>) attributes {dimension_semantics = [#tpu.dimension_semantics<parallel>], iteration_bounds = array<i64: 1>, scalar_prefetch = 0 : i64, scratch_operands = 0 : i64, tpu.core_type = #tpu.core_type<tc>, window_params = [{transform_indices = @transform_0, window_bounds = array<i64: 16, 32>}, {pipeline_mode = #tpu.pipeline_mode<synchronous>, transform_indices = @transform_1, window_bounds = array<i64: 32, 128>}, {pipeline_mode = #tpu.pipeline_mode<synchronous>, transform_indices = @transform_2, window_bounds = array<i64: 1, 128>}, {pipeline_mode = #tpu.pipeline_mode<synchronous>, transform_indices = @transform_3, window_bounds = array<i64: 128, 128>}, {pipeline_mode = #tpu.pipeline_mode<synchronous>, transform_indices = @transform_4, window_bounds = array<i64: 1, 128>}, {transform_indices = @transform_5, window_bounds = array<i64: 16, 128>}]} {
    %c0 = arith.constant 0 : index
    %c0_0 = arith.constant 0 : index
    %0 = vector.load %arg1[%c0, %c0_0] : memref<16x32xf32, #tpu.memory_space<vmem>>, vector<16x32xf32>
    %1 = arith.truncf %0 : vector<16x32xf32> to vector<16x32xbf16>
    %c0_1 = arith.constant 0 : index
    %c0_2 = arith.constant 0 : index
    %2 = vector.load %arg2[%c0_1, %c0_2] : memref<32x128xbf16, #tpu.memory_space<vmem>>, vector<32x128xbf16>
    %cst = arith.constant dense<0.000000e+00> : vector<16x128xf32>
    %3 = tpu.matmul %1, %2, %cst {dimension_numbers = #tpu.dot_dimension_numbers<[1], [0], [0], [1], [0, 0, 1, 1], [], []>} : vector<16x32xbf16>, vector<32x128xbf16>, vector<16x128xf32> -> vector<16x128xf32>
    %c0_3 = arith.constant 0 : index
    %c0_4 = arith.constant 0 : index
    %4 = vector.load %arg3[%c0_3, %c0_4] : memref<1x128xf32, #tpu.memory_space<vmem>>, vector<1x128xf32>
    %5 = vector.broadcast %4 : vector<1x128xf32> to vector<16x128xf32>
    %6 = arith.addf %3, %5 : vector<16x128xf32>
    %cst_5 = arith.constant 0.000000e+00 : f32
    %7 = vector.broadcast %cst_5 : f32 to vector<16x128xf32>
    %8 = arith.maximumf %6, %7 : vector<16x128xf32>
    %9 = arith.truncf %8 : vector<16x128xf32> to vector<16x128xbf16>
    %c0_6 = arith.constant 0 : index
    %c0_7 = arith.constant 0 : index
    %10 = vector.load %arg4[%c0_6, %c0_7] : memref<128x128xbf16, #tpu.memory_space<vmem>>, vector<128x128xbf16>
    %cst_8 = arith.constant dense<0.000000e+00> : vector<16x128xf32>
    %11 = tpu.matmul %9, %10, %cst_8 {dimension_numbers = #tpu.dot_dimension_numbers<[1], [0], [0], [1], [0, 0, 1, 1], [], []>} : vector<16x128xbf16>, vector<128x128xbf16>, vector<16x128xf32> -> vector<16x128xf32>
    %c0_9 = arith.constant 0 : index
    %c0_10 = arith.constant 0 : index
    %12 = vector.load %arg5[%c0_9, %c0_10] : memref<1x128xf32, #tpu.memory_space<vmem>>, vector<1x128xf32>
    %13 = vector.broadcast %12 : vector<1x128xf32> to vector<16x128xf32>
    %14 = arith.addf %11, %13 : vector<16x128xf32>
    %cst_11 = arith.constant 0.000000e+00 : f32
    %15 = vector.broadcast %cst_11 : f32 to vector<16x128xf32>
    %16 = arith.maximumf %14, %15 : vector<16x128xf32>
    %17 = arith.truncf %16 : vector<16x128xf32> to vector<16x128xbf16>
    %c0_12 = arith.constant 0 : index
    %c0_13 = arith.constant 0 : index
    %18 = vector.load %arg6[%c0_12, %c0_13] : memref<16x128xbf16, #tpu.memory_space<vmem>>, vector<16x128xbf16>
    tpu.vector_store %arg6[%c0_12, %c0_13], %17 {strides = array<i32>} : memref<16x128xbf16, #tpu.memory_space<vmem>>, vector<16x128xbf16>,
    return
  }
  func.func @transform_0(%arg0: i32) -> (i32, i32) {
    %c0_i32 = arith.constant 0 : i32
    %c0_i32_0 = arith.constant 0 : i32
    return %arg0, %c0_i32 : i32, i32
  }
  func.func @transform_1(%arg0: i32) -> (i32, i32) {
    %c0_i32 = arith.constant 0 : i32
    %c0_i32_0 = arith.constant 0 : i32
    %c0_i32_1 = arith.constant 0 : i32
    return %c0_i32, %c0_i32_0 : i32, i32
  }
  func.func @transform_2(%arg0: i32) -> (i32, i32) {
    %c0_i32 = arith.constant 0 : i32
    %c0_i32_0 = arith.constant 0 : i32
    %c0_i32_1 = arith.constant 0 : i32
    return %c0_i32, %c0_i32_0 : i32, i32
  }
  func.func @transform_3(%arg0: i32) -> (i32, i32) {
    %c0_i32 = arith.constant 0 : i32
    %c0_i32_0 = arith.constant 0 : i32
    %c0_i32_1 = arith.constant 0 : i32
    return %c0_i32, %c0_i32_0 : i32, i32
  }
  func.func @transform_4(%arg0: i32) -> (i32, i32) {
    %c0_i32 = arith.constant 0 : i32
    %c0_i32_0 = arith.constant 0 : i32
    %c0_i32_1 = arith.constant 0 : i32
    return %c0_i32, %c0_i32_0 : i32, i32
  }
  func.func @transform_5(%arg0: i32) -> (i32, i32) {
    %c0_i32 = arith.constant 0 : i32
    %c0_i32_0 = arith.constant 0 : i32
    return %arg0, %c0_i32 : i32, i32
  }
}

module attributes {stable_mosaic.version = 11 : i64} {
  func.func @_mlp_fused_kernel(%arg0: i32, %arg1: memref<16x32xf32, #tpu.memory_space<vmem>>, %arg2: memref<32x128xbf16, #tpu.memory_space<vmem>>, %arg3: memref<1x128xf32, #tpu.memory_space<vmem>>, %arg4: memref<128x128xbf16, #tpu.memory_space<vmem>>, %arg5: memref<1x128xf32, #tpu.memory_space<vmem>>, %arg6: memref<16x128xbf16, #tpu.memory_space<vmem>>) attributes {dimension_semantics = [#tpu.dimension_semantics<parallel>], iteration_bounds = array<i64: 1>, scalar_prefetch = 0 : i64, scratch_operands = 0 : i64, tpu.core_type = #tpu.core_type<tc>, window_params = [{transform_indices = @transform_0, window_bounds = array<i64: 16, 32>}, {pipeline_mode = #tpu.pipeline_mode<synchronous>, transform_indices = @transform_1, window_bounds = array<i64: 32, 128>}, {pipeline_mode = #tpu.pipeline_mode<synchronous>, transform_indices = @transform_2, window_bounds = array<i64: 1, 128>}, {pipeline_mode = #tpu.pipeline_mode<synchronous>, transform_indices = @transform_3, window_bounds = array<i64: 128, 128>}, {pipeline_mode = #tpu.pipeline_mode<synchronous>, transform_indices = @transform_4, window_bounds = array<i64: 1, 128>}, {transform_indices = @transform_5, window_bounds = array<i64: 16, 128>}]} {
    %c0 = arith.constant 0 : index
    %c0_0 = arith.constant 0 : index
    %0 = vector.load %arg1[%c0, %c0_0] : memref<16x32xf32, #tpu.memory_space<vmem>>, vector<16x32xf32>
    %1 = arith.truncf %0 : vector<16x32xf32> to vector<16x32xbf16>
    %c0_1 = arith.constant 0 : index
    %c0_2 = arith.constant 0 : index
    %2 = vector.load %arg2[%c0_1, %c0_2] : memref<32x128xbf16, #tpu.memory_space<vmem>>, vector<32x128xbf16>
    %cst = arith.constant dense<0.000000e+00> : vector<16x128xf32>
    %3 = tpu.matmul %1, %2, %cst {dimension_numbers = #tpu.dot_dimension_numbers<[1], [0], [0], [1], [0, 0, 1, 1], [], []>} : vector<16x32xbf16>, vector<32x128xbf16>, vector<16x128xf32> -> vector<16x128xf32>
    %c0_3 = arith.constant 0 : index
    %c0_4 = arith.constant 0 : index
    %4 = vector.load %arg3[%c0_3, %c0_4] : memref<1x128xf32, #tpu.memory_space<vmem>>, vector<1x128xf32>
    %5 = vector.broadcast %4 : vector<1x128xf32> to vector<16x128xf32>
    %6 = arith.addf %3, %5 : vector<16x128xf32>
    %cst_5 = arith.constant 0.000000e+00 : f32
    %7 = vector.broadcast %cst_5 : f32 to vector<16x128xf32>
    %8 = arith.maximumf %6, %7 : vector<16x128xf32>
    %9 = arith.truncf %8 : vector<16x128xf32> to vector<16x128xbf16>
    %c0_6 = arith.constant 0 : index
    %c0_7 = arith.constant 0 : index
    %10 = vector.load %arg4[%c0_6, %c0_7] : memref<128x128xbf16, #tpu.memory_space<vmem>>, vector<128x128xbf16>
    %cst_8 = arith.constant dense<0.000000e+00> : vector<16x128xf32>
    %11 = tpu.matmul %9, %10, %cst_8 {dimension_numbers = #tpu.dot_dimension_numbers<[1], [0], [0], [1], [0, 0, 1, 1], [], []>} : vector<16x128xbf16>, vector<128x128xbf16>, vector<16x128xf32> -> vector<16x128xf32>
    %c0_9 = arith.constant 0 : index
    %c0_10 = arith.constant 0 : index
    %12 = vector.load %arg5[%c0_9, %c0_10] : memref<1x128xf32, #tpu.memory_space<vmem>>, vector<1x128xf32>
    %13 = vector.broadcast %12 : vector<1x128xf32> to vector<16x128xf32>
    %14 = arith.addf %11, %13 : vector<16x128xf32>
    %cst_11 = arith.constant 0.000000e+00 : f32
    %15 = vector.broadcast %cst_11 : f32 to vector<16x128xf32>
    %16 = arith.maximumf %14, %15 : vector<16x128xf32>
    %17 = arith.truncf %16 : vector<16x128xf32> to vector<16x128xbf16>
    %c0_12 = arith.constant 0 : index
    %c0_13 = arith.constant 0 : index
    %18 = vector.load %arg6[%c0_12, %c0_13] : memref<16x128xbf16, #tpu.memory_space<vmem>>, vector<16x128xbf16>
    tpu.vector_store %arg6[%c0_12, %c0_13], %17 {strides = array<i32>} : memref<16x128xbf16, #tpu.memory_space<vmem>>, vector<16x128xbf16>,
    return
  }
  func.func @transform_0(%arg0: i32) -> (i32, i32) {
    %c0_i32 = arith.constant 0 : i32
    %c0_i32_0 = arith.constant 0 : i32
    return %arg0, %c0_i32 : i32, i32
  }
  func.func @transform_1(%arg0: i32) -> (i32, i32) {
    %c0_i32 = arith.constant 0 : i32
    %c0_i32_0 = arith.constant 0 : i32
    %c0_i32_1 = arith.constant 0 : i32
    return %c0_i32, %c0_i32_0 : i32, i32
  }
  func.func @transform_2(%arg0: i32) -> (i32, i32) {
    %c0_i32 = arith.constant 0 : i32
    %c0_i32_0 = arith.constant 0 : i32
    %c0_i32_1 = arith.constant 0 : i32
    return %c0_i32, %c0_i32_0 : i32, i32
  }
  func.func @transform_3(%arg0: i32) -> (i32, i32) {
    %c0_i32 = arith.constant 0 : i32
    %c0_i32_0 = arith.constant 0 : i32
    %c0_i32_1 = arith.constant 0 : i32
    return %c0_i32, %c0_i32_0 : i32, i32
  }
  func.func @transform_4(%arg0: i32) -> (i32, i32) {
    %c0_i32 = arith.constant 0 : i32
    %c0_i32_0 = arith.constant 0 : i32
    %c0_i32_1 = arith.constant 0 : i32
    return %c0_i32, %c0_i32_0 : i32, i32
  }
  func.func @transform_5(%arg0: i32) -> (i32, i32) {
    %c0_i32 = arith.constant 0 : i32
    %c0_i32_0 = arith.constant 0 : i32
    return %arg0, %c0_i32 : i32, i32
  }
}

</mosaic_0001>

<bundles_post_ra>
// kernel: tpu_custom_call.1
= control target key start
LH: loop header
LB: loop body
LE: loop exit
PB: predicated region body
PF: predicated region fallthrough
CT: control target
= control target key end

     0   :  { %10 = vsyncpa [#allocation3], 0  ;;  %s558_s0 = inlined_call_operand.hbm [shape: f32[16,32], index: 0, kind: input, shape index: {}]   ;;  %s559_s1 = inlined_call_operand.hbm [shape: bf16[32,128], index: 1, kind: input, shape index: {}]   ;;  %s560_s2 = inlined_call_operand.vmem [shape: f32[1,128], index: 2, kind: input, shape index: {}]   ;;  %s561_s3 = inlined_call_operand.hbm [shape: bf16[128,128], index: 3, kind: input, shape index: {}]   ;;  %s562_s4 = inlined_call_operand.vmem [shape: f32[1,128], index: 4, kind: input, shape index: {}]   ;;  %s563_s5 = inlined_call_operand.hbm [shape: bf16[16,128], index: 5, kind: output, shape index: {}]  }
   0x1   :  { %11 = vsyncpa [#allocation6], 0 }
   0x2   :  { %12 = vsyncpa [#allocation4], 0  ;;  %s455_s18 = smov [#allocation5]   ;;  %s361_s22 = scalar_lea.hbm %s559_s1, 256 }
   0x3   :  { %s30_s19 = sshll.u32 %s455_s18, 4  ;;  %p362_p0 = scmp.ne.s32.totalorder %s559_s1, %s361_s22  ;;  %s31_s19 = int_to_ptr.vmem [resolvable:$true] %s30_s19 }
   0x4   :  { %p365_p1 = scmp.lt.u32.totalorder %s361_s22, %s559_s1 }
   0x6   :  { %p367_p2 = pnand %p365_p1, %p362_p0 }
   0x8   :  { %370 = shalt.err (!%p367_p2)
}
   0x9   :  { %s371_s27 = scalar_lea.vmem %s31_s19, 256  ;;  %p376_p4 = scmp.lt.s32.totalorder %s31_s19, %s31_s19 }
   0xa   :  { %p372_p3 = scmp.ne.s32.totalorder %s31_s19, %s371_s27  ;;  %p377_p5 = scmp.lt.s32.totalorder %s371_s27, %s371_s27 }
   0xc   :  { %p378_p6 = por %p377_p5, %p376_p4 }
   0xe   :  { %p379_p7 = pnand %p378_p6, %p372_p3 }
  0x10   :  { %382 = shalt.err (!%p379_p7)
}
  0x11   :  { %s456_s28 = smov 64   ;;  %s457_s29 = smov 4  }
  0x12   :  { %36 = dma.hbm_to_vmem [thread:$0]  %s559_s1, 256, %s31_s19, [#allocation6], %s456_s28, %s456_s28, %s457_s29  }
  0x13   :  { %s458_s7 = smov [#allocation2]   ;;  %s383_s11 = scalar_lea.hbm %s558_s0, 256 }
  0x14   :  { %s18_s8 = sshll.u32 %s458_s7, 4  ;;  %p384_p8 = scmp.ne.s32.totalorder %s558_s0, %s383_s11  ;;  %s19_s8 = int_to_ptr.vmem [resolvable:$true] %s18_s8 }
  0x15   :  { %p387_p9 = scmp.lt.u32.totalorder %s383_s11, %s558_s0 }
  0x17   :  { %p389_p10 = pnand %p387_p9, %p384_p8 }
  0x19   :  { %392 = shalt.err (!%p389_p10)
}
  0x1a   :  { %s393_s16 = scalar_lea.vmem %s19_s8, 256  ;;  %p398_p12 = scmp.lt.s32.totalorder %s19_s8, %s19_s8 }
  0x1b   :  { %p394_p11 = scmp.ne.s32.totalorder %s19_s8, %s393_s16  ;;  %p399_p13 = scmp.lt.s32.totalorder %s393_s16, %s393_s16 }
  0x1d   :  { %p400_p0 = por %p399_p13, %p398_p12 }
  0x1f   :  { %p401_p1 = pnand %p400_p0, %p394_p11 }
  0x21   :  { %404 = shalt.err (!%p401_p1)
}
  0x22   :  { %s459_s1 = smov 128   ;;  %s460_s17 = smov 8  }
  0x23   :  { %24 = dma.hbm_to_vmem [thread:$0]  %s558_s0, 256, %s19_s8, [#allocation3], %s459_s1, %s459_s1, %s460_s17  }
  0x24   :  { %s461_s20 = smov [#allocation7]   ;;  %s405_s24 = scalar_lea.hbm %s561_s3, 1024 }
  0x25   :  { %s44_s21 = sshll.u32 %s461_s20, 4  ;;  %p406_p2 = scmp.ne.s32.totalorder %s561_s3, %s405_s24  ;;  %s45_s21 = int_to_ptr.vmem [resolvable:$true] %s44_s21 }
  0x26   :  { %p409_p3 = scmp.lt.u32.totalorder %s405_s24, %s561_s3 }
  0x28   :  { %p411_p4 = pnand %p409_p3, %p406_p2 }
  0x2a   :  { %414 = shalt.err (!%p411_p4)
}
  0x2b   :  { %s415_s6 = scalar_lea.vmem %s45_s21, 1024  ;;  %p420_p6 = scmp.lt.s32.totalorder %s45_s21, %s45_s21 }
  0x2c   :  { %p416_p5 = scmp.ne.s32.totalorder %s45_s21, %s415_s6  ;;  %p421_p7 = scmp.lt.s32.totalorder %s415_s6, %s415_s6 }
  0x2e   :  { %p422_p8 = por %p421_p7, %p420_p6 }
  0x30   :  { %p423_p9 = pnand %p422_p8, %p416_p5 }
  0x32   :  { %426 = shalt.err (!%p423_p9)
}
  0x33   :  { %50 = dma.hbm_to_vmem [thread:$0]  %s561_s3, 1024, %s45_s21, [#allocation6], %s456_s28, %s456_s28, %s457_s29  }
  0x34   :  { %449 = dma.done.wait [#allocation3], 256  }
  0x35   :  { %450 = vsyncadd [#allocation3], 4294967040 }
  0x36   :  { %451 = dma.done.wait [#allocation6], 1280  }
  0x37   :  { %452 = vsyncadd [#allocation6], 4294966016  ;;  %v462_v0 = vmov 0.0   ;;  %vm463_vm0 = vmmov 0   ;;  %v351_v1 = vld [vmem:[#allocation5] sm:$0xff]   ;;  %v352_v2 = vld [vmem:[#allocation5 + $0x8] sm:$0xff]  }
  0x38   :  { %313 = vmatprep.subr.bf16.mxu0 %v462_v0  ;;  %317 = vmatprep.mubr.msk.bf16.mxu0 %vm463_vm0, %v462_v0  ;;  %v63_v3 = vld [vmem:[#allocation2] sm:$0xff]  ;;  %v64_v4 = vld [vmem:[#allocation2 + $0x8] sm:$0xff]  ;;  %vm89_vm1 = vcmask 261120   ;;  %v355_v8 = vld [vmem:[#allocation7 + $0x10] sm:$0xff]  }
  0x39   :  { %321 = vmatprep.subr.bf16.mxu1 %v462_v0  ;;  %337 = vmatprep.mubr.msk.bf16.mxu1 %vm463_vm0, %v462_v0  ;;  %v353_v5 = vld [vmem:[#allocation7] sm:$0xff]   ;;  %v65_v6 = vpack.c.bf16 %v64_v4, %v63_v3  ;;  %v354_v7 = vld [vmem:[#allocation7 + $0x8] sm:$0xff]   ;;  %v356_v9 = vld [vmem:[#allocation7 + $0x18] sm:$0xff]  }
  0x3a   :  { %314 = vmatpush3.bf16.msra.mxu0 %v351_v1  ;;  %322 = vmatpush3.bf16.msra.mxu1 %v353_v5  ;;  %v357_v10 = vld [vmem:[#allocation7 + $0x20] sm:$0xff]   ;;  %v358_v11 = vld [vmem:[#allocation7 + $0x28] sm:$0xff]   ;;  %v359_v12 = vld [vmem:[#allocation7 + $0x30] sm:$0xff]  }
  0x3b   :  { %315 = vmatprep.subr.bf16.mxu0 %v462_v0  ;;  %323 = vmatprep.subr.bf16.mxu1 %v462_v0  ;;  %v360_v13 = vld [vmem:[#allocation7 + $0x38] sm:$0xff]   ;;  %v279_v14 = vld [vmem:[%s560_s2] ss:$0 sm:$0xff]  ;;  %s464_s2 = smov [#allocation8]  }
  0x3c   :  { %v283_v24 = vld [vmem:[%s562_s4] ss:$0 sm:$0xff]  ;;  %s266_s11 = sshll.u32 %s464_s2, 4  ;;  %s267_s11 = int_to_ptr.vmem [resolvable:$true] %s266_s11 }
  0x3d   :  { %s427_s12 = scalar_lea.vmem %s267_s11, 128  ;;  %p432_p11 = scmp.lt.s32.totalorder %s267_s11, %s267_s11 }
  0x3e   :  { %316 = vmatpush3.bf16.msra.mxu0 %v352_v2  ;;  %324 = vmatpush3.bf16.msra.mxu1 %v354_v7  ;;  %p428_p10 = scmp.ne.s32.totalorder %s267_s11, %s427_s12  ;;  %p433_p12 = scmp.lt.s32.totalorder %s427_s12, %s427_s12 }
  0x3f   :  { %325 = vmatprep.subr.bf16.mxu1 %v462_v0 }
  0x40   :  { %p434_p13 = por %p433_p12, %p432_p11 }
  0x41   :  { %318 = vmatmul.mubr.msk.bf16.vlgmr.msra.gmra.mrb[0].mxu0 %vm89_vm1, %v65_v6 }
  0x42   :  { %326 = vmatpush3.bf16.msra.mxu1 %v355_v8  ;;  %p435_p0 = pnand %p434_p13, %p428_p10 }
  0x43   :  { %327 = vmatprep.subr.bf16.mxu1 %v462_v0 }
  0x46   :  { %328 = vmatpush3.bf16.msra.mxu1 %v356_v9 }
  0x47   :  { %329 = vmatprep.subr.bf16.mxu1 %v462_v0 }
  0x4a   :  { %330 = vmatpush3.bf16.msra.mxu1 %v357_v10 }
  0x4b   :  { %331 = vmatprep.subr.bf16.mxu1 %v462_v0 }
  0x4e   :  { %332 = vmatpush3.bf16.msra.mxu1 %v358_v11 }
  0x4f   :  { %333 = vmatprep.subr.bf16.mxu1 %v462_v0 }
  0x52   :  { %334 = vmatpush3.bf16.msra.mxu1 %v359_v12 }
  0x53   :  { %335 = vmatprep.subr.bf16.mxu1 %v462_v0 }
  0x56   :  { %336 = vmatpush3.bf16.msra.mxu1 %v360_v13 }
 0x114   :  { %v127_v15 = vpop.f32.mrb[0].mxu0 }
 0x115   :  { %v128_v16 = vadd.f32 %v279_v14, %v127_v15  ;;  %v319_v17 = vpop.f32.mrb[1].mxu0 }
 0x116   :  { %v130_v18 = vpop.f32.mrb[2].mxu0 }
 0x117   :  { %v131_v19 = vadd.f32 %v279_v14, %v130_v18  ;;  %v320_v20 = vpop.f32.mrb[3].mxu0  ;;  %v134_v21 = vmax.f32 %v128_v16, 0.0 }
 0x119   :  { %v135_v22 = vmax.f32 %v131_v19, 0.0 }
 0x11b   :  { %v136_v23 = vpack.c.bf16 %v135_v22, %v134_v21 }
 0x11d   :  { %338 = vmatmul.mubr.bf16.vlgmr.msra.gmra.mrb[0].mxu1 %v136_v23 }
 0x1f0   :  { %v242_v25 = vpop.f32.mrb[0].mxu1 }
 0x1f1   :  { %v243_v26 = vadd.f32 %v283_v24, %v242_v25  ;;  %v339_v27 = vpop.f32.mrb[1].mxu1 }
 0x1f2   :  { %v245_v28 = vpop.f32.mrb[2].mxu1 }
 0x1f3   :  { %v246_v29 = vadd.f32 %v283_v24, %v245_v28  ;;  %v340_v30 = vpop.f32.mrb[3].mxu1  ;;  %v249_v31 = vmax.f32 %v243_v26, 0.0 }
 0x1f5   :  { %v250_v32 = vmax.f32 %v246_v29, 0.0 }
 0x1f7   :  { %v299_v33 = vpack.c.bf16 %v250_v32, %v249_v31 }
 0x1f9   :  { %300 = vst [vmem:[#allocation8] sm:$0xff] %v299_v33  }
 0x1fa   :  { %438 = shalt.err (!%p435_p0)
}
 0x1fb   :  { %s439_s14 = scalar_lea.hbm %s563_s5, 128 }
 0x1fc   :  { %p440_p1 = scmp.ne.s32.totalorder %s563_s5, %s439_s14  ;;  %p443_p2 = scmp.lt.u32.totalorder %s439_s14, %s563_s5 }
 0x1fe   :  { %p445_p3 = pnand %p443_p2, %p440_p1 }
 0x200   :  { %448 = shalt.err (!%p445_p3)
}
 0x201   :  { %272 = dma.vmem_to_hbm [thread:$0]  %s267_s11, 128, %s563_s5, [#allocation4], %s456_s28, %s456_s28, %s457_s29  }
 0x202   :  { %453 = dma.done.wait [#allocation4], 128  }
 0x203   :  { %454 = vsyncadd [#allocation4], 4294967168 }
 0x204   :  { %276 = vsyncpa [#allocation3], 1 }
 0x205   :  { %277 = vsyncpa [#allocation6], 1 }
 0x206   :  { %278 = vsyncpa [#allocation4], 1 }

// kernel: tpu_custom_call.1
= control target key start
LH: loop header
LB: loop body
LE: loop exit
PB: predicated region body
PF: predicated region fallthrough
CT: control target
= control target key end

     0   :  { %10 = vsyncpa [#allocation3], 0  ;;  %s558_s0 = inlined_call_operand.hbm [shape: f32[16,32], index: 0, kind: input, shape index: {}]   ;;  %s559_s1 = inlined_call_operand.hbm [shape: bf16[32,128], index: 1, kind: input, shape index: {}]   ;;  %s560_s2 = inlined_call_operand.vmem [shape: f32[1,128], index: 2, kind: input, shape index: {}]   ;;  %s561_s3 = inlined_call_operand.hbm [shape: bf16[128,128], index: 3, kind: input, shape index: {}]   ;;  %s562_s4 = inlined_call_operand.vmem [shape: f32[1,128], index: 4, kind: input, shape index: {}]   ;;  %s563_s5 = inlined_call_operand.hbm [shape: bf16[16,128], index: 5, kind: output, shape index: {}]  }
   0x1   :  { %11 = vsyncpa [#allocation6], 0 }
   0x2   :  { %12 = vsyncpa [#allocation4], 0  ;;  %s455_s18 = smov [#allocation5]   ;;  %s361_s22 = scalar_lea.hbm %s559_s1, 256 }
   0x3   :  { %s30_s19 = sshll.u32 %s455_s18, 4  ;;  %p362_p0 = scmp.ne.s32.totalorder %s559_s1, %s361_s22  ;;  %s31_s19 = int_to_ptr.vmem [resolvable:$true] %s30_s19 }
   0x4   :  { %p365_p1 = scmp.lt.u32.totalorder %s361_s22, %s559_s1 }
   0x6   :  { %p367_p2 = pnand %p365_p1, %p362_p0 }
   0x8   :  { %370 = shalt.err (!%p367_p2)
}
   0x9   :  { %s371_s27 = scalar_lea.vmem %s31_s19, 256  ;;  %p376_p4 = scmp.lt.s32.totalorder %s31_s19, %s31_s19 }
   0xa   :  { %p372_p3 = scmp.ne.s32.totalorder %s31_s19, %s371_s27  ;;  %p377_p5 = scmp.lt.s32.totalorder %s371_s27, %s371_s27 }
   0xc   :  { %p378_p6 = por %p377_p5, %p376_p4 }
   0xe   :  { %p379_p7 = pnand %p378_p6, %p372_p3 }
  0x10   :  { %382 = shalt.err (!%p379_p7)
}
  0x11   :  { %s456_s28 = smov 64   ;;  %s457_s29 = smov 4  }
  0x12   :  { %36 = dma.hbm_to_vmem [thread:$0]  %s559_s1, 256, %s31_s19, [#allocation6], %s456_s28, %s456_s28, %s457_s29  }
  0x13   :  { %s458_s7 = smov [#allocation2]   ;;  %s383_s11 = scalar_lea.hbm %s558_s0, 256 }
  0x14   :  { %s18_s8 = sshll.u32 %s458_s7, 4  ;;  %p384_p8 = scmp.ne.s32.totalorder %s558_s0, %s383_s11  ;;  %s19_s8 = int_to_ptr.vmem [resolvable:$true] %s18_s8 }
  0x15   :  { %p387_p9 = scmp.lt.u32.totalorder %s383_s11, %s558_s0 }
  0x17   :  { %p389_p10 = pnand %p387_p9, %p384_p8 }
  0x19   :  { %392 = shalt.err (!%p389_p10)
}
  0x1a   :  { %s393_s16 = scalar_lea.vmem %s19_s8, 256  ;;  %p398_p12 = scmp.lt.s32.totalorder %s19_s8, %s19_s8 }
  0x1b   :  { %p394_p11 = scmp.ne.s32.totalorder %s19_s8, %s393_s16  ;;  %p399_p13 = scmp.lt.s32.totalorder %s393_s16, %s393_s16 }
  0x1d   :  { %p400_p0 = por %p399_p13, %p398_p12 }
  0x1f   :  { %p401_p1 = pnand %p400_p0, %p394_p11 }
  0x21   :  { %404 = shalt.err (!%p401_p1)
}
  0x22   :  { %s459_s1 = smov 128   ;;  %s460_s17 = smov 8  }
  0x23   :  { %24 = dma.hbm_to_vmem [thread:$0]  %s558_s0, 256, %s19_s8, [#allocation3], %s459_s1, %s459_s1, %s460_s17  }
  0x24   :  { %s461_s20 = smov [#allocation7]   ;;  %s405_s24 = scalar_lea.hbm %s561_s3, 1024 }
  0x25   :  { %s44_s21 = sshll.u32 %s461_s20, 4  ;;  %p406_p2 = scmp.ne.s32.totalorder %s561_s3, %s405_s24  ;;  %s45_s21 = int_to_ptr.vmem [resolvable:$true] %s44_s21 }
  0x26   :  { %p409_p3 = scmp.lt.u32.totalorder %s405_s24, %s561_s3 }
  0x28   :  { %p411_p4 = pnand %p409_p3, %p406_p2 }
  0x2a   :  { %414 = shalt.err (!%p411_p4)
}
  0x2b   :  { %s415_s6 = scalar_lea.vmem %s45_s21, 1024  ;;  %p420_p6 = scmp.lt.s32.totalorder %s45_s21, %s45_s21 }
  0x2c   :  { %p416_p5 = scmp.ne.s32.totalorder %s45_s21, %s415_s6  ;;  %p421_p7 = scmp.lt.s32.totalorder %s415_s6, %s415_s6 }
  0x2e   :  { %p422_p8 = por %p421_p7, %p420_p6 }
  0x30   :  { %p423_p9 = pnand %p422_p8, %p416_p5 }
  0x32   :  { %426 = shalt.err (!%p423_p9)
}
  0x33   :  { %50 = dma.hbm_to_vmem [thread:$0]  %s561_s3, 1024, %s45_s21, [#allocation6], %s456_s28, %s456_s28, %s457_s29  }
  0x34   :  { %449 = dma.done.wait [#allocation3], 256  }
  0x35   :  { %450 = vsyncadd [#allocation3], 4294967040 }
  0x36   :  { %451 = dma.done.wait [#allocation6], 1280  }
  0x37   :  { %452 = vsyncadd [#allocation6], 4294966016  ;;  %v462_v0 = vmov 0.0   ;;  %vm463_vm0 = vmmov 0   ;;  %v351_v1 = vld [vmem:[#allocation5] sm:$0xff]   ;;  %v352_v2 = vld [vmem:[#allocation5 + $0x8] sm:$0xff]  }
  0x38   :  { %313 = vmatprep.subr.bf16.mxu0 %v462_v0  ;;  %317 = vmatprep.mubr.msk.bf16.mxu0 %vm463_vm0, %v462_v0  ;;  %v63_v3 = vld [vmem:[#allocation2] sm:$0xff]  ;;  %v64_v4 = vld [vmem:[#allocation2 + $0x8] sm:$0xff]  ;;  %vm89_vm1 = vcmask 261120   ;;  %v355_v8 = vld [vmem:[#allocation7 + $0x10] sm:$0xff]  }
  0x39   :  { %321 = vmatprep.subr.bf16.mxu1 %v462_v0  ;;  %337 = vmatprep.mubr.msk.bf16.mxu1 %vm463_vm0, %v462_v0  ;;  %v353_v5 = vld [vmem:[#allocation7] sm:$0xff]   ;;  %v65_v6 = vpack.c.bf16 %v64_v4, %v63_v3  ;;  %v354_v7 = vld [vmem:[#allocation7 + $0x8] sm:$0xff]   ;;  %v356_v9 = vld [vmem:[#allocation7 + $0x18] sm:$0xff]  }
  0x3a   :  { %314 = vmatpush3.bf16.msra.mxu0 %v351_v1  ;;  %322 = vmatpush3.bf16.msra.mxu1 %v353_v5  ;;  %v357_v10 = vld [vmem:[#allocation7 + $0x20] sm:$0xff]   ;;  %v358_v11 = vld [vmem:[#allocation7 + $0x28] sm:$0xff]   ;;  %v359_v12 = vld [vmem:[#allocation7 + $0x30] sm:$0xff]  }
  0x3b   :  { %315 = vmatprep.subr.bf16.mxu0 %v462_v0  ;;  %323 = vmatprep.subr.bf16.mxu1 %v462_v0  ;;  %v360_v13 = vld [vmem:[#allocation7 + $0x38] sm:$0xff]   ;;  %v279_v14 = vld [vmem:[%s560_s2] ss:$0 sm:$0xff]  ;;  %s464_s2 = smov [#allocation8]  }
  0x3c   :  { %v283_v24 = vld [vmem:[%s562_s4] ss:$0 sm:$0xff]  ;;  %s266_s11 = sshll.u32 %s464_s2, 4  ;;  %s267_s11 = int_to_ptr.vmem [resolvable:$true] %s266_s11 }
  0x3d   :  { %s427_s12 = scalar_lea.vmem %s267_s11, 128  ;;  %p432_p11 = scmp.lt.s32.totalorder %s267_s11, %s267_s11 }
  0x3e   :  { %316 = vmatpush3.bf16.msra.mxu0 %v352_v2  ;;  %324 = vmatpush3.bf16.msra.mxu1 %v354_v7  ;;  %p428_p10 = scmp.ne.s32.totalorder %s267_s11, %s427_s12  ;;  %p433_p12 = scmp.lt.s32.totalorder %s427_s12, %s427_s12 }
  0x3f   :  { %325 = vmatprep.subr.bf16.mxu1 %v462_v0 }
  0x40   :  { %p434_p13 = por %p433_p12, %p432_p11 }
  0x41   :  { %318 = vmatmul.mubr.msk.bf16.vlgmr.msra.gmra.mrb[0].mxu0 %vm89_vm1, %v65_v6 }
  0x42   :  { %326 = vmatpush3.bf16.msra.mxu1 %v355_v8  ;;  %p435_p0 = pnand %p434_p13, %p428_p10 }
  0x43   :  { %327 = vmatprep.subr.bf16.mxu1 %v462_v0 }
  0x46   :  { %328 = vmatpush3.bf16.msra.mxu1 %v356_v9 }
  0x47   :  { %329 = vmatprep.subr.bf16.mxu1 %v462_v0 }
  0x4a   :  { %330 = vmatpush3.bf16.msra.mxu1 %v357_v10 }
  0x4b   :  { %331 = vmatprep.subr.bf16.mxu1 %v462_v0 }
  0x4e   :  { %332 = vmatpush3.bf16.msra.mxu1 %v358_v11 }
  0x4f   :  { %333 = vmatprep.subr.bf16.mxu1 %v462_v0 }
  0x52   :  { %334 = vmatpush3.bf16.msra.mxu1 %v359_v12 }
  0x53   :  { %335 = vmatprep.subr.bf16.mxu1 %v462_v0 }
  0x56   :  { %336 = vmatpush3.bf16.msra.mxu1 %v360_v13 }
 0x114   :  { %v127_v15 = vpop.f32.mrb[0].mxu0 }
 0x115   :  { %v128_v16 = vadd.f32 %v279_v14, %v127_v15  ;;  %v319_v17 = vpop.f32.mrb[1].mxu0 }
 0x116   :  { %v130_v18 = vpop.f32.mrb[2].mxu0 }
 0x117   :  { %v131_v19 = vadd.f32 %v279_v14, %v130_v18  ;;  %v320_v20 = vpop.f32.mrb[3].mxu0  ;;  %v134_v21 = vmax.f32 %v128_v16, 0.0 }
 0x119   :  { %v135_v22 = vmax.f32 %v131_v19, 0.0 }
 0x11b   :  { %v136_v23 = vpack.c.bf16 %v135_v22, %v134_v21 }
 0x11d   :  { %338 = vmatmul.mubr.bf16.vlgmr.msra.gmra.mrb[0].mxu1 %v136_v23 }
 0x1f0   :  { %v242_v25 = vpop.f32.mrb[0].mxu1 }
 0x1f1   :  { %v243_v26 = vadd.f32 %v283_v24, %v242_v25  ;;  %v339_v27 = vpop.f32.mrb[1].mxu1 }
 0x1f2   :  { %v245_v28 = vpop.f32.mrb[2].mxu1 }
 0x1f3   :  { %v246_v29 = vadd.f32 %v283_v24, %v245_v28  ;;  %v340_v30 = vpop.f32.mrb[3].mxu1  ;;  %v249_v31 = vmax.f32 %v243_v26, 0.0 }
 0x1f5   :  { %v250_v32 = vmax.f32 %v246_v29, 0.0 }
 0x1f7   :  { %v299_v33 = vpack.c.bf16 %v250_v32, %v249_v31 }
 0x1f9   :  { %300 = vst [vmem:[#allocation8] sm:$0xff] %v299_v33  }
 0x1fa   :  { %438 = shalt.err (!%p435_p0)
}
 0x1fb   :  { %s439_s14 = scalar_lea.hbm %s563_s5, 128 }
 0x1fc   :  { %p440_p1 = scmp.ne.s32.totalorder %s563_s5, %s439_s14  ;;  %p443_p2 = scmp.lt.u32.totalorder %s439_s14, %s563_s5 }
 0x1fe   :  { %p445_p3 = pnand %p443_p2, %p440_p1 }
 0x200   :  { %448 = shalt.err (!%p445_p3)
}
 0x201   :  { %272 = dma.vmem_to_hbm [thread:$0]  %s267_s11, 128, %s563_s5, [#allocation4], %s456_s28, %s456_s28, %s457_s29  }
 0x202   :  { %453 = dma.done.wait [#allocation4], 128  }
 0x203   :  { %454 = vsyncadd [#allocation4], 4294967168 }
 0x204   :  { %276 = vsyncpa [#allocation3], 1 }
 0x205   :  { %277 = vsyncpa [#allocation6], 1 }
 0x206   :  { %278 = vsyncpa [#allocation4], 1 }

</bundles_post_ra>
